<compile_context>
chip_gen: v7x
topology: tpu7x:2x2x1
jax: 0.10.0
libtpu: 0.0.40
codegen_flags: <defaults>
</compile_context>

<pallas_src>
import functools

import jax
import jax.numpy as jnp
from jax.experimental import pallas as pl
from jax.experimental.pallas import tpu as pltpu

MXU_DTYPE = jnp.bfloat16   # MXU operand / HBM activation dtype (f32 accumulation)
LANE = 128
SUBLANE = 8


def _round_up(x, m):
    return (x + m - 1) // m * m


def _vmem_capacity_bytes():
    try:
        info = pltpu.get_tpu_info()
        cap = getattr(info, "vmem_capacity_bytes", None)
        if cap:
            return int(cap)
    except Exception:
        pass
    return 64 * 1024 * 1024        # conservative default (v7x per-TC VMEM)


def activation_unit_kernel(item_ref, ub_ref, w_ref, b_in_ref, w_out_ref,
                           alpha_ref, out_ref, *, valid_t):
    # item_ref : (Bt, E)      bf16 query-item rows of this batch tile
    # ub_ref   : (Bt, Tp, E)  bf16 user-behavior rows of this batch tile
    # w_ref    : (3E, Pp)     bf16 stacked folded weight [W1+W3; W2-W3; W4]
    # b_in_ref : (1, Pp) f32 ;  w_out_ref : (1, Pp) f32 (linear_out weight row)
    # alpha_ref: (1, 1) f32 scalar in SMEM (PReLU slope)
    # out_ref  : (Bt, Tp) f32 softmax attention weights (lane-dense)
    Bt, Tp, E = ub_ref.shape
    Pp = w_ref.shape[1]

    ub = ub_ref[...]                                            # (Bt, Tp, E) bf16
    item_b = jnp.broadcast_to(item_ref[...][:, None, :], (Bt, Tp, E))
    prod = item_b * ub                                          # bf16 VPU product

    # linear_in via the algebraic fold of the concatenated input, K-stacked so
    # a single MXU matmul (K = 3E) does all of it:
    #   [ie, ub, ie-ub, ie*ub] @ W == [ie, ub, ie*ub] @ [W1+W3; W2-W3; W4]
    x = jnp.concatenate([item_b, ub, prod], axis=-1)            # (Bt, Tp, 3E) bf16
    h = jnp.dot(x.reshape(Bt * Tp, 3 * E), w_ref[...],
                preferred_element_type=jnp.float32)             # (Bt*Tp, Pp) f32
    h = h.reshape(Bt, Tp, Pp) + b_in_ref[...]

    # PReLU (single shared slope, nn.PReLU() default) in f32
    alpha = alpha_ref[0, 0]
    h = jnp.where(h >= 0.0, h, alpha * h)

    # linear_out (N = 1): VPU multiply + lane reduction.  The output bias is
    # dropped: softmax over T is shift-invariant, so it is dead work.
    logits = jnp.sum(h * w_out_ref[...], axis=-1)               # (Bt, Tp) f32

    if valid_t != Tp:   # static: mask sequence-padding positions
        pos = jax.lax.broadcasted_iota(jnp.int32, (Bt, Tp), 1)
        logits = jnp.where(pos < valid_t, logits, -1e30)

    # softmax over the sequence axis (last / lane axis here)
    m = jnp.max(logits, axis=-1, keepdims=True)
    e = jnp.exp(logits - m)
    s = jnp.sum(e, axis=-1, keepdims=True)
    out_ref[...] = (e * pl.reciprocal(s, approx=True)).astype(out_ref.dtype)


def activation_unit(item, user_behavior, w_in, b_in, alpha, w_out, b_out,
                    *, batch_tile=None):
    """item: (B, 1, E), user_behavior: (B, T, E) -> (B, T) attention weights."""
    del b_out  # softmax is shift-invariant; the output bias has no effect
    B, _, E = item.shape
    _, T, _ = user_behavior.shape
    P = w_in.shape[1]
    Pp = _round_up(P, LANE)
    Tp = _round_up(T, SUBLANE)

    # --- fold the concat into one stacked (3E, Pp) weight (once, in f32) ---
    w1, w2, w3, w4 = (w_in[0:E], w_in[E:2 * E], w_in[2 * E:3 * E], w_in[3 * E:4 * E])
    w_stack = jnp.concatenate([w1 + w3, w2 - w3, w4], axis=0)          # (3E, P)
    pad_p = ((0, 0), (0, Pp - P))
    w_stack = jnp.pad(w_stack, pad_p).astype(MXU_DTYPE)                # (3E, Pp) bf16
    b_in_p = jnp.pad(jnp.asarray(b_in, jnp.float32).reshape(1, P), pad_p)
    w_out_row = jnp.pad(jnp.asarray(w_out, jnp.float32).reshape(1, P), pad_p)
    alpha_s = jnp.asarray(alpha, jnp.float32).reshape(1, 1)

    # --- activations shipped to HBM in bf16 (halves the dominant DMA) ---
    item2d = jnp.asarray(item).reshape(B, E).astype(MXU_DTYPE)
    ub = jnp.asarray(user_behavior).astype(MXU_DTYPE)
    if Tp != T:
        ub = jnp.pad(ub, ((0, 0), (0, Tp - T), (0, 0)))

    # --- generation-aware VMEM budget ---
    vmem_cap = _vmem_capacity_bytes()
    budget = (96 << 20) if vmem_cap >= (128 << 20) else (40 << 20)

    # --- batch tiling: target ~2K MXU rows (Bt*Tp) per grid step ---
    if batch_tile is None:
        if B <= 8:
            batch_tile = B                      # single step, block == full dims
        else:
            per_row = (Tp * (2 * 2 * E * 2      # ub, double-buffered, bf16
                             + 3 * E * 2        # concat LHS, bf16
                             + 2 * Pp * 4       # h + PReLU temp, f32
                             + 2 * 4)           # out, double-buffered, f32
                       + 2 * 2 * E * 2)         # item, double-buffered, bf16
            weight_bytes = 2 * (3 * E * Pp * 2 + 2 * Pp * 4)
            avail = max(budget - weight_bytes - (8 << 20), per_row * 8)
            bt_cap = max(8, (avail // per_row) // 8 * 8)
            target = max(8, _round_up(pl.cdiv(2048, Tp), 8))
            B8 = _round_up(B, 8)
            bt = min(target, bt_cap, B8)
            # guarantee >= 2 grid steps so both v7x TensorCores get work
            if bt >= B8:
                bt = max(8, _round_up(pl.cdiv(B8, 2), 8))
            batch_tile = bt
    Bt = int(batch_tile)
    B_pad = _round_up(B, Bt)
    n_tiles = B_pad // Bt
    if B_pad != B:
        item2d = jnp.pad(item2d, ((0, B_pad - B), (0, 0)))
        ub = jnp.pad(ub, ((0, B_pad - B), (0, 0), (0, 0)))

    flops = 2 * B_pad * Tp * (3 * E) * Pp + 6 * B_pad * Tp * Pp
    bytes_accessed = ((item2d.size + ub.size) * 2 + B_pad * Tp * 4
                      + 3 * E * Pp * 2 + 2 * Pp * 4)

    out = pl.pallas_call(
        functools.partial(activation_unit_kernel, valid_t=T),
        out_shape=jax.ShapeDtypeStruct((B_pad, Tp), jnp.float32),
        grid=(n_tiles,),
        in_specs=[
            pl.BlockSpec((Bt, E), lambda b: (b, 0)),             # item rows (bf16)
            pl.BlockSpec((Bt, Tp, E), lambda b: (b, 0, 0)),      # user behavior (bf16)
            pl.BlockSpec((3 * E, Pp), lambda b: (0, 0)),         # stacked folded weight
            pl.BlockSpec((1, Pp), lambda b: (0, 0)),             # b_in (padded)
            pl.BlockSpec((1, Pp), lambda b: (0, 0)),             # linear_out row
            pl.BlockSpec(memory_space=pltpu.MemorySpace.SMEM),   # prelu alpha
        ],
        out_specs=pl.BlockSpec((Bt, Tp), lambda b: (b, 0)),
        compiler_params=pltpu.CompilerParams(
            dimension_semantics=("parallel",),
            vmem_limit_bytes=int(budget)),
        cost_estimate=pl.CostEstimate(
            flops=int(flops), transcendentals=int(B_pad * Tp),
            bytes_accessed=int(bytes_accessed)),
    )(item2d, ub, w_stack, b_in_p, w_out_row, alpha_s)
    return out[:B, :T]


def reference(item, user_behavior, w_in, b_in, alpha, w_out, b_out):
    """Plain-JAX (f32) reference of the PyTorch forward (activation='prelu')."""
    ie = jnp.broadcast_to(item, user_behavior.shape)
    x = jnp.concatenate(
        [ie, user_behavior, ie - user_behavior, ie * user_behavior], axis=-1)
    h = x @ w_in + b_in[0]
    h = jnp.where(h >= 0, h, alpha[0, 0] * h)
    logits = (h @ w_out)[..., 0] + b_out[0, 0]
    return jax.nn.softmax(logits, axis=1)


def _make_inputs(key, B, T, E, P):
    k1, k2, k3, k4, k5, k6 = jax.random.split(key, 6)
    item = jax.random.normal(k1, (B, 1, E), dtype=jnp.float32)
    user_behavior = jax.random.normal(k2, (B, T, E), dtype=jnp.float32)
    bound_in = (4 * E) ** -0.5
    w_in = jax.random.uniform(k3, (4 * E, P), jnp.float32, -bound_in, bound_in)
    b_in = jax.random.uniform(k4, (1, P), jnp.float32, -bound_in, bound_in)
    bound_out = P ** -0.5
    w_out = jax.random.uniform(k5, (P, 1), jnp.float32, -bound_out, bound_out)
    b_out = jax.random.uniform(k6, (1, 1), jnp.float32, -bound_out, bound_out)
    alpha = jnp.full((1, 1), 0.25, jnp.float32)   # nn.PReLU() default init
    return item, user_behavior, w_in, b_in, alpha, w_out, b_out


if __name__ == "__main__":
    key = jax.random.PRNGKey(0)
    k1, k2, k3 = jax.random.split(key, 3)

    # --- small case: single batch tile (block == full dims) ---
    B, T, E = 2, 8, 32
    P = E  # proj_dim defaults to embed_dim
    args = _make_inputs(k1, B, T, E, P)
    out = jax.block_until_ready(activation_unit(*args))
    ref = reference(*args)
    assert out.shape == (B, T), out.shape
    assert jnp.allclose(out, ref, atol=2e-2, rtol=0), (out, ref)
    assert jnp.allclose(jnp.sum(out, axis=1), 1.0, atol=5e-3)

    # --- larger case: batch tiling + batch padding + >=2 grid steps ---
    B2 = 33
    args2 = _make_inputs(k2, B2, T, E, P)
    out2 = jax.block_until_ready(activation_unit(*args2))
    ref2 = reference(*args2)
    assert out2.shape == (B2, T), out2.shape
    assert jnp.allclose(out2, ref2, atol=2e-2, rtol=0), (out2, ref2)
    assert jnp.allclose(jnp.sum(out2, axis=1), 1.0, atol=5e-3)

    # --- ragged-T case: exercises T padding + softmax masking ---
    B3, T3 = 4, 5
    args3 = _make_inputs(k3, B3, T3, E, P)
    out3 = jax.block_until_ready(activation_unit(*args3))
    ref3 = reference(*args3)
    assert out3.shape == (B3, T3), out3.shape
    assert jnp.allclose(out3, ref3, atol=2e-2, rtol=0), (out3, ref3)
    assert jnp.allclose(jnp.sum(out3, axis=1), 1.0, atol=5e-3)

    print("KERNEL_OK")
</pallas_src>

<mosaic_0001>
module attributes {stable_mosaic.version = 11 : i64} {
  func.func @activation_unit_kernel(%arg0: i32, %arg1: memref<2x32xbf16, #tpu.memory_space<vmem>>, %arg2: memref<2x8x32xbf16, #tpu.memory_space<vmem>>, %arg3: memref<96x128xbf16, #tpu.memory_space<vmem>>, %arg4: memref<1x128xf32, #tpu.memory_space<vmem>>, %arg5: memref<1x128xf32, #tpu.memory_space<vmem>>, %arg6: memref<1x1xf32, #tpu.memory_space<smem>>, %arg7: memref<2x8xf32, #tpu.memory_space<vmem>>) attributes {dimension_semantics = [#tpu.dimension_semantics<parallel>], iteration_bounds = array<i64: 1>, scalar_prefetch = 0 : i64, scratch_operands = 0 : i64, tpu.core_type = #tpu.core_type<tc>, window_params = [{transform_indices = @transform_0, window_bounds = array<i64: 2, 32>}, {transform_indices = @transform_1, window_bounds = array<i64: 2, 8, 32>}, {pipeline_mode = #tpu.pipeline_mode<synchronous>, transform_indices = @transform_2, window_bounds = array<i64: 96, 128>}, {pipeline_mode = #tpu.pipeline_mode<synchronous>, transform_indices = @transform_3, window_bounds = array<i64: 1, 128>}, {pipeline_mode = #tpu.pipeline_mode<synchronous>, transform_indices = @transform_4, window_bounds = array<i64: 1, 128>}, {transform_indices = @transform_5, window_bounds = array<i64: 1, 1>}, {transform_indices = @transform_6, window_bounds = array<i64: 2, 8>}]} {
    %c0 = arith.constant 0 : index
    %c0_0 = arith.constant 0 : index
    %c0_1 = arith.constant 0 : index
    %0 = vector.load %arg2[%c0, %c0_0, %c0_1] : memref<2x8x32xbf16, #tpu.memory_space<vmem>>, vector<2x8x32xbf16>
    %c0_2 = arith.constant 0 : index
    %c0_3 = arith.constant 0 : index
    %1 = vector.load %arg1[%c0_2, %c0_3] : memref<2x32xbf16, #tpu.memory_space<vmem>>, vector<2x32xbf16>
    %2 = vector.shape_cast %1 : vector<2x32xbf16> to vector<2x1x32xbf16>
    %3 = vector.shape_cast %2 : vector<2x1x32xbf16> to vector<2x1x32xbf16>
    %4 = vector.broadcast %3 : vector<2x1x32xbf16> to vector<2x8x32xbf16>
    %5 = arith.mulf %4, %0 : vector<2x8x32xbf16>
    %6 = tpu.concatenate %4, %0, %5 in 2 : vector<2x8x32xbf16>, vector<2x8x32xbf16>, vector<2x8x32xbf16> -> vector<2x8x96xbf16>
    %7 = vector.shape_cast %6 : vector<2x8x96xbf16> to vector<16x96xbf16>
    %c0_4 = arith.constant 0 : index
    %c0_5 = arith.constant 0 : index
    %8 = vector.load %arg3[%c0_4, %c0_5] : memref<96x128xbf16, #tpu.memory_space<vmem>>, vector<96x128xbf16>
    %cst = arith.constant dense<0.000000e+00> : vector<16x128xf32>
    %9 = tpu.matmul %7, %8, %cst {dimension_numbers = #tpu.dot_dimension_numbers<[1], [0], [0], [1], [0, 0, 1, 1], [], []>} : vector<16x96xbf16>, vector<96x128xbf16>, vector<16x128xf32> -> vector<16x128xf32>
    %10 = vector.shape_cast %9 : vector<16x128xf32> to vector<2x8x128xf32>
    %c0_6 = arith.constant 0 : index
    %c0_7 = arith.constant 0 : index
    %11 = vector.load %arg4[%c0_6, %c0_7] : memref<1x128xf32, #tpu.memory_space<vmem>>, vector<1x128xf32>
    %12 = vector.shape_cast %11 : vector<1x128xf32> to vector<1x1x128xf32>
    %13 = vector.broadcast %12 : vector<1x1x128xf32> to vector<2x8x128xf32>
    %14 = arith.addf %10, %13 : vector<2x8x128xf32>
    %c0_8 = arith.constant 0 : index
    %c0_9 = arith.constant 0 : index
    %15 = memref.load %arg6[%c0_8, %c0_9] : memref<1x1xf32, #tpu.memory_space<smem>>
    %cst_10 = arith.constant 0.000000e+00 : f32
    %16 = vector.broadcast %cst_10 : f32 to vector<2x8x128xf32>
    %17 = arith.cmpf oge, %14, %16 : vector<2x8x128xf32>
    %18 = vector.broadcast %15 : f32 to vector<2x8x128xf32>
    %19 = arith.mulf %18, %14 : vector<2x8x128xf32>
    %20 = arith.select %17, %14, %19 : vector<2x8x128xi1>, vector<2x8x128xf32>
    %c0_11 = arith.constant 0 : index
    %c0_12 = arith.constant 0 : index
    %21 = vector.load %arg5[%c0_11, %c0_12] : memref<1x128xf32, #tpu.memory_space<vmem>>, vector<1x128xf32>
    %22 = vector.shape_cast %21 : vector<1x128xf32> to vector<1x1x128xf32>
    %23 = vector.broadcast %22 : vector<1x1x128xf32> to vector<2x8x128xf32>
    %24 = arith.mulf %20, %23 : vector<2x8x128xf32>
    %cst_13 = arith.constant dense<0.000000e+00> : vector<2x8xf32>
    %25 = vector.multi_reduction <add>, %24, %cst_13 [2] : vector<2x8x128xf32> to vector<2x8xf32>
    %cst_14 = arith.constant dense<0xFF800000> : vector<2xf32>
    %26 = vector.multi_reduction <maximumf>, %25, %cst_14 [1] : vector<2x8xf32> to vector<2xf32>
    %27 = vector.shape_cast %26 : vector<2xf32> to vector<2x1xf32>
    %28 = vector.broadcast %27 : vector<2x1xf32> to vector<2x8xf32>
    %29 = arith.subf %25, %28 : vector<2x8xf32>
    %30 = math.exp %29 : vector<2x8xf32>
    %cst_15 = arith.constant dense<0.000000e+00> : vector<2xf32>
    %31 = vector.multi_reduction <add>, %30, %cst_15 [1] : vector<2x8xf32> to vector<2xf32>
    %32 = vector.shape_cast %31 : vector<2xf32> to vector<2x1xf32>
    %33 = tpu.reciprocal %32 {approx = true} : vector<2x1xf32> -> vector<2x1xf32>
    %34 = vector.broadcast %33 : vector<2x1xf32> to vector<2x8xf32>
    %35 = arith.mulf %30, %34 : vector<2x8xf32>
    %c0_16 = arith.constant 0 : index
    %c0_17 = arith.constant 0 : index
    %36 = vector.load %arg7[%c0_16, %c0_17] : memref<2x8xf32, #tpu.memory_space<vmem>>, vector<2x8xf32>
    tpu.vector_store %arg7[%c0_16, %c0_17], %35 {strides = array<i32>} : memref<2x8xf32, #tpu.memory_space<vmem>>, vector<2x8xf32>,
    return
  }
  func.func @transform_0(%arg0: i32) -> (i32, i32) {
    %c0_i32 = arith.constant 0 : i32
    %c0_i32_0 = arith.constant 0 : i32
    return %arg0, %c0_i32 : i32, i32
  }
  func.func @transform_1(%arg0: i32) -> (i32, i32, i32) {
    %c0_i32 = arith.constant 0 : i32
    %c0_i32_0 = arith.constant 0 : i32
    %c0_i32_1 = arith.constant 0 : i32
    return %arg0, %c0_i32, %c0_i32_0 : i32, i32, i32
  }
  func.func @transform_2(%arg0: i32) -> (i32, i32) {
    %c0_i32 = arith.constant 0 : i32
    %c0_i32_0 = arith.constant 0 : i32
    %c0_i32_1 = arith.constant 0 : i32
    return %c0_i32, %c0_i32_0 : i32, i32
  }
  func.func @transform_3(%arg0: i32) -> (i32, i32) {
    %c0_i32 = arith.constant 0 : i32
    %c0_i32_0 = arith.constant 0 : i32
    %c0_i32_1 = arith.constant 0 : i32
    return %c0_i32, %c0_i32_0 : i32, i32
  }
  func.func @transform_4(%arg0: i32) -> (i32, i32) {
    %c0_i32 = arith.constant 0 : i32
    %c0_i32_0 = arith.constant 0 : i32
    %c0_i32_1 = arith.constant 0 : i32
    return %c0_i32, %c0_i32_0 : i32, i32
  }
  func.func @transform_5(%arg0: i32) -> (i32, i32) {
    %c0_i32 = arith.constant 0 : i32
    %c0_i32_0 = arith.constant 0 : i32
    %c0_i32_1 = arith.constant 0 : i32
    return %c0_i32, %c0_i32_0 : i32, i32
  }
  func.func @transform_6(%arg0: i32) -> (i32, i32) {
    %c0_i32 = arith.constant 0 : i32
    %c0_i32_0 = arith.constant 0 : i32
    return %arg0, %c0_i32 : i32, i32
  }
}

</mosaic_0001>

<bundles_post_ra>
// kernel: tpu_custom_call.1
= control target key start
LH: loop header
LB: loop body
LE: loop exit
PB: predicated region body
PF: predicated region fallthrough
CT: control target
= control target key end

     0   :  { %12 = vsyncpa [#allocation4], 0  ;;  %s600_s0 = inlined_call_operand.vmem [shape: bf16[2,32], index: 0, kind: input, shape index: {}]   ;;  %s601_s1 = inlined_call_operand.hbm [shape: bf16[2,8,32], index: 1, kind: input, shape index: {}]   ;;  %s602_s2 = inlined_call_operand.hbm [shape: bf16[96,128], index: 2, kind: input, shape index: {}]   ;;  %s603_s3 = inlined_call_operand.vmem [shape: f32[1,128], index: 3, kind: input, shape index: {}]   ;;  %s604_s4 = inlined_call_operand.vmem [shape: f32[1,128], index: 4, kind: input, shape index: {}]   ;;  %s605_s5 = inlined_call_operand.<no memory space> [shape: f32[1,1], index: 5, kind: input, shape index: {}]   ;;  %s606_s6 = inlined_call_operand.hbm [shape: f32[2,8], index: 6, kind: output, shape index: {}]  }
   0x1   :  { %13 = vsyncpa [#allocation7], 0 }
   0x2   :  { %14 = vsyncpa [#allocation5], 0  ;;  %s481_s21 = smov [#allocation3]   ;;  %s409_s25 = scalar_lea.hbm %s601_s1, 128 }
   0x3   :  { %s22_s22 = sshll.u32 %s481_s21, 4  ;;  %p410_p0 = scmp.ne.s32.totalorder %s601_s1, %s409_s25  ;;  %s23_s22 = int_to_ptr.vmem [resolvable:$true] %s22_s22 }
   0x4   :  { %p413_p1 = scmp.lt.u32.totalorder %s409_s25, %s601_s1 }
   0x6   :  { %p415_p2 = pnand %p413_p1, %p410_p0 }
   0x8   :  { %418 = shalt.err (!%p415_p2)
}
   0x9   :  { %s419_s30 = scalar_lea.vmem %s23_s22, 128  ;;  %p424_p4 = scmp.lt.s32.totalorder %s23_s22, %s23_s22 }
   0xa   :  { %p420_p3 = scmp.ne.s32.totalorder %s23_s22, %s419_s30  ;;  %p425_p5 = scmp.lt.s32.totalorder %s419_s30, %s419_s30 }
   0xc   :  { %p426_p6 = por %p425_p5, %p424_p4 }
   0xe   :  { %p427_p7 = pnand %p426_p6, %p420_p3 }
  0x10   :  { %430 = shalt.err (!%p427_p7)
}
  0x11   :  { %s482_s7 = smov 64   ;;  %s483_s8 = smov 4  }
  0x12   :  { %28 = dma.hbm_to_vmem [thread:$0]  %s601_s1, 128, %s23_s22, [#allocation4], %s482_s7, %s482_s7, %s483_s8  }
  0x13   :  { %s484_s11 = smov [#allocation6]   ;;  %s431_s15 = scalar_lea.hbm %s602_s2, 768 }
  0x14   :  { %s34_s12 = sshll.u32 %s484_s11, 4  ;;  %p432_p8 = scmp.ne.s32.totalorder %s602_s2, %s431_s15  ;;  %s35_s12 = int_to_ptr.vmem [resolvable:$true] %s34_s12 }
  0x15   :  { %p435_p9 = scmp.lt.u32.totalorder %s431_s15, %s602_s2 }
  0x17   :  { %p437_p10 = pnand %p435_p9, %p432_p8 }
  0x19   :  { %440 = shalt.err (!%p437_p10)
}
  0x1a   :  { %s441_s20 = scalar_lea.vmem %s35_s12, 768  ;;  %p446_p12 = scmp.lt.s32.totalorder %s35_s12, %s35_s12 }
  0x1b   :  { %p442_p11 = scmp.ne.s32.totalorder %s35_s12, %s441_s20  ;;  %p447_p13 = scmp.lt.s32.totalorder %s441_s20, %s441_s20 }
  0x1d   :  { %p448_p0 = por %p447_p13, %p446_p12 }
  0x1f   :  { %p449_p1 = pnand %p448_p0, %p442_p11 }
  0x21   :  { %452 = shalt.err (!%p449_p1)
}
  0x22   :  { %40 = dma.hbm_to_vmem [thread:$0]  %s602_s2, 768, %s35_s12, [#allocation7], %s482_s7, %s482_s7, %s483_s8  }
  0x23   :  { %475 = dma.done.wait [#allocation4], 128  }
  0x24   :  { %476 = vsyncadd [#allocation4], 4294967168 }
  0x25   :  { %477 = dma.done.wait [#allocation7], 768  }
  0x26   :  { %478 = vsyncadd [#allocation7], 4294966528  ;;  %v62_v0 = vlaneseq  ;;  %v485_v1 = vmov 0.0   ;;  %v54_v4 = vld [vmem:[#allocation3] sm:$0xf]  ;;  %v397_v10 = vld [vmem:[#allocation6] sm:$0xff]   ;;  %v224_v37 = vstv %s605_s5 }
  0x27   :  { %368 = vmatprep.subr.bf16.mxu0 %v485_v1  ;;  %v56_v5 = vld [vmem:[%s600_s0] sm:$0x1]  ;;  %v55_v6 = vld [vmem:[#allocation3 + $0x4] sm:$0xf]  ;;  %v349_v7 = vcombine.low %v54_v4, %v54_v4  ;;  %s486_s2 = smov 32   ;;  %v398_v14 = vld [vmem:[#allocation6 + $0x8] sm:$0xff]  }
  0x28   :  { %v554_v2 = vshrl.u32 %v62_v0, 7  ;;  %v348_v8 = vpack.i.b16 %v56_v5, %v56_v5  ;;  %v59_v9 = vunpack.i.h.s16 %v56_v5  ;;  %v350_v12 = vcombine.low %v55_v6, %v55_v6  ;;  %369 = vmatpush3.bf16.msra.mxu0 %v397_v10  ;;  %v399_v19 = vld [vmem:[#allocation6 + $0x10] sm:$0xff]   ;;  %v400_v23 = vld [vmem:[#allocation6 + $0x18] sm:$0xff]   ;;  %v401_v24 = vld [vmem:[#allocation6 + $0x20] sm:$0xff]  }
  0x29   :  { %92 = vrot.lane.b32.xlu0 %v349_v7, %s486_s2  ;;  %370 = vmatprep.subr.bf16.mxu0 %v485_v1  ;;  %vm487_vm0 = vmmov 0   ;;  %v402_v25 = vld [vmem:[#allocation6 + $0x28] sm:$0xff]   ;;  %vm102_vm1 = vcmask 261120   ;;  %vm109_vm2 = vcmask 523264   ;;  %vm167_vm3 = vcmask 785408  }
  0x2a   :  { %v557_v3 = vsub.s32 0, %v554_v2  ;;  %v61_v13 = vpack.i.b16 %v59_v9, %v59_v9  ;;  %380 = vmatprep.mubr.msk.bf16.mxu0 %vm487_vm0, %v485_v1  ;;  %v359_v35 = vld [vmem:[%s603_s3] ss:$0 sm:$0xff]  ;;  %v245_v50 = vand.u32 127, %v62_v0  ;;  %vm254_vm6 = vcmask 1041409   ;;  %s489_s3 = smov [#allocation8]  }
  0x2b   :  { %v360_v44 = vld [vmem:[%s604_s4] ss:$0 sm:$0xff]  ;;  %vm257_vm7 = vcmask 58368   ;;  %v488_v58 = vmov 0   ;;  %v268_v59 = vsub.s32 1, %v554_v2  ;;  %s338_s4 = sshll.u32 %s489_s3, 4  ;;  %s339_s4 = int_to_ptr.vmem [resolvable:$true] %s338_s4 }
  0x2c   :  { %v65_v11 = vrot.slane %v348_v8, %v557_v3  ;;  %v69_v16 = vrot.slane %v61_v13, %v557_v3  ;;  %371 = vmatpush3.bf16.msra.mxu0 %v398_v14  ;;  %v248_v51 = vsub.s32 %v245_v50, %v554_v2  ;;  %394 = vset.pattern.permute.xlu1 %v488_v58  ;;  %s453_s5 = scalar_lea.vmem %s339_s4, 32  ;;  %p458_p3 = scmp.lt.s32.totalorder %s339_s4, %s339_s4 }
  0x2d   :  { %94 = vrot.lane.b32.xlu0 %v350_v12, %s486_s2  ;;  %372 = vmatprep.subr.bf16.mxu0 %v485_v1  ;;  %p454_p2 = scmp.ne.s32.totalorder %s339_s4, %s453_s5  ;;  %p459_p4 = scmp.lt.s32.totalorder %s453_s5, %s453_s5 }
  0x2e   :  { %v71_v15 = vpack.i.b16 %v65_v11, %v65_v11  ;;  %v78_v18 = vpack.i.b16 %v69_v16, %v69_v16  ;;  %393 = vset.pattern.permute.xlu0 %v488_v58 }
  0x2f   :  { %p460_p5 = por %p459_p4, %p458_p3 }
  0x30   :  { %v76_v17 = vrot.slane %v71_v15, %v557_v3  ;;  %v83_v21 = vrot.slane %v78_v18, %v557_v3  ;;  %373 = vmatpush3.bf16.msra.mxu0 %v399_v19 }
  0x31   :  { %374 = vmatprep.subr.bf16.mxu0 %v485_v1  ;;  %p461_p6 = pnand %p460_p5, %p454_p2 }
  0x32   :  { %v84_v20 = vmul.bf16 %v76_v17, %v54_v4  ;;  %v85_v22 = vmul.bf16 %v83_v21, %v55_v6 }
  0x34   :  { %98 = vrot.lane.b32.xlu1 %v84_v20, %s482_s7  ;;  %375 = vmatpush3.bf16.msra.mxu0 %v400_v23 }
  0x35   :  { %376 = vmatprep.subr.bf16.mxu0 %v485_v1 }
  0x38   :  { %100 = vrot.lane.b32.xlu1 %v85_v22, %s482_s7  ;;  %377 = vmatpush3.bf16.msra.mxu0 %v401_v24 }
  0x39   :  { %378 = vmatprep.subr.bf16.mxu0 %v485_v1 }
  0x3c   :  { %379 = vmatpush3.bf16.msra.mxu0 %v402_v25 }
  0x9b   :  { %v93_v26 = vpop.permute.xlu0 %92 }
  0x9c   :  { %v105_v29 = vsel %vm102_vm1, %v76_v17, %v93_v26 }
  0x9f   :  { %v95_v27 = vpop.permute.xlu0 %94 }
  0xa0   :  { %v108_v30 = vsel %vm102_vm1, %v83_v21, %v95_v27 }
  0xa6   :  { %v99_v28 = vpop.permute.xlu1 %98 }
  0xa7   :  { %v111_v32 = vsel %vm109_vm2, %v105_v29, %v99_v28 }
  0xaa   :  { %v101_v31 = vpop.permute.xlu1 %100 }
  0xab   :  { %v113_v33 = vsel %vm109_vm2, %v108_v30, %v101_v31 }
  0xac   :  { %v351_v34 = vcombine.low %v111_v32, %v113_v33 }
  0xae   :  { %381 = vmatmul.mubr.msk.bf16.vlgmr.msra.gmra.mrb[0].mxu0 %vm167_vm3, %v351_v34 }
 0x181   :  { %v205_v36 = vpop.f32.mrb[0].mxu0 }
 0x182   :  { %v219_v38 = vadd.f32 %v359_v35, %v205_v36  ;;  %v382_v39 = vpop.f32.mrb[1].mxu0 }
 0x183   :  { %v208_v40 = vpop.f32.mrb[2].mxu0 }
 0x184   :  { %v225_v41 = vmul.f32 %v224_v37, %v219_v38  ;;  %v220_v42 = vadd.f32 %v359_v35, %v208_v40  ;;  %v383_v43 = vpop.f32.mrb[3].mxu0  ;;  %vm222_vm4 = vcmp.ge.f32.partialorder %v219_v38, 0.0 }
 0x186   :  { %v226_v45 = vmul.f32 %v224_v37, %v220_v42  ;;  %v227_v46 = vsel %vm222_vm4, %v219_v38, %v225_v41  ;;  %vm223_vm5 = vcmp.ge.f32.partialorder %v220_v42, 0.0 }
 0x187   :  { %v236_v47 = vmul.f32 %v360_v44, %v227_v46 }
 0x188   :  { %v228_v48 = vsel %vm223_vm5, %v220_v42, %v226_v45 }
 0x189   :  { %238 = vadd.xlane.f32.xlu0 %v236_v47  ;;  %v237_v49 = vmul.f32 %v360_v44, %v228_v48 }
 0x18b   :  { %240 = vadd.xlane.f32.xlu1 %v237_v49 }
 0x216   :  { %v239_v52 = vpop.xlane.xlu0 %238 }
 0x217   :  { %v249_v54 = vrot.slane %v239_v52, %v248_v51 }
 0x218   :  { %v241_v53 = vpop.xlane.xlu1 %240 }
 0x219   :  { %v253_v55 = vrot.slane %v241_v53, %v248_v51 }
 0x21b   :  { %v255_v56 = vsel %vm254_vm6, %v253_v55, %v249_v54 }
 0x21c   :  { %v258_v57 = vsel %vm257_vm7, %v255_v56, -inf }
 0x21d   :  { %259 = vmax.xlane.f32.xlu0 %v258_v57 }
 0x2aa   :  { %v260_v60 = vpop.xlane.xlu0 %259 }
 0x2ab   :  { %v265_v61 = vrot.slane %v260_v60, %v557_v3  ;;  %v269_v62 = vrot.slane %v260_v60, %v268_v59 }
 0x2ad   :  { %v272_v63 = vsub.f32 %v239_v52, %v265_v61  ;;  %v273_v0 = vsub.f32 %v241_v53, %v269_v62 }
 0x2af   :  { %v274_v1 = vmul.f32 1.442695, %v272_v63  ;;  %v276_v4 = vmul.f32 1.442695, %v273_v0 }
 0x2b1   :  { %403 = vpow2.f32 %v274_v1 }
 0x2b2   :  { %405 = vpow2.f32 %v276_v4 }
 0x2bb   :  { %v404_v5 = vpop.eup %403 }
 0x2bc   :  { %v406_v6 = vpop.eup %405  ;;  %281 = vperm.xlu0 %393, %v404_v5  }
 0x2bd   :  { %284 = vperm.xlu1 %394, %v406_v6  }
 0x33b   :  { %v282_v7 = vpop.permute.xlu0 %281 }
 0x33c   :  { %v285_v8 = vpop.permute.xlu1 %284  ;;  %v289_v9 = vrot.slane %v282_v7, %v248_v51 }
 0x33d   :  { %v293_v10 = vrot.slane %v285_v8, %v248_v51 }
 0x33f   :  { %v294_v2 = vsel %vm254_vm6, %v293_v10, %v289_v9 }
 0x340   :  { %v296_v11 = vsel %vm257_vm7, %v294_v2, 0.0 }
 0x341   :  { %297 = vadd.xlane.f32.xlu1 %v296_v11 }
 0x3ce   :  { %v298_v12 = vpop.xlane.xlu1 %297 }
 0x3cf   :  { %407 = vrcp.f32 %v298_v12 }
 0x3d9   :  { %v408_v13 = vpop.eup %407 }
 0x3da   :  { %v304_v14 = vrot.slane %v408_v13, %v557_v3  ;;  %v308_v16 = vrot.slane %v408_v13, %v268_v59 }
 0x3dc   :  { %v311_v15 = vmul.f32 %v404_v5, %v304_v14  ;;  %v312_v17 = vmul.f32 %v406_v6, %v308_v16 }
 0x3de   :  { %316 = vperm.xlu0 %393, %v311_v15  }
 0x3e2   :  { %319 = vperm.xlu0 %393, %v312_v17  }
 0x45d   :  { %v317_v18 = vpop.permute.xlu0 %316 }
 0x45e   :  { %v324_v20 = vrot.slane %v317_v18, %v248_v51 }
 0x461   :  { %v320_v19 = vpop.permute.xlu0 %319 }
 0x462   :  { %v328_v21 = vrot.slane %v320_v19, %v248_v51 }
 0x464   :  { %v329_v22 = vsel %vm254_vm6, %v328_v21, %v324_v20 }
 0x465   :  { %331 = vst.msk [vmem:[#allocation8] sm:$0x3] %vm257_vm7, %v329_v22 }
 0x466   :  { %464 = shalt.err (!%p461_p6)
}
 0x467   :  { %s465_s7 = scalar_lea.hbm %s606_s6, 32 }
 0x468   :  { %p466_p7 = scmp.ne.s32.totalorder %s606_s6, %s465_s7  ;;  %p469_p8 = scmp.lt.u32.totalorder %s465_s7, %s606_s6 }
 0x46a   :  { %p471_p9 = pnand %p469_p8, %p466_p7 }
 0x46c   :  { %474 = shalt.err (!%p471_p9)
}
 0x46d   :  { %341 = dma.vmem_to_hbm [thread:$0]  %s339_s4, 32, %s606_s6, [#allocation5]  }
 0x46e   :  { %479 = dma.done.wait [#allocation5], 32  }
 0x46f   :  { %480 = vsyncadd [#allocation5], 4294967264 }
 0x470   :  { %345 = vsyncpa [#allocation4], 1 }
 0x471   :  { %346 = vsyncpa [#allocation7], 1 }
 0x472   :  { %347 = vsyncpa [#allocation5], 1 }

</bundles_post_ra>
